<compile_context>
chip_gen: v6e
topology: v6e:2x2x1
jax: 0.10.0
libtpu: 0.0.40
codegen_flags: <defaults>
</compile_context>

<pallas_src>
import functools

import jax
import jax.numpy as jnp
from jax import lax
from jax.experimental import pallas as pl
from jax.experimental.pallas import tpu as pltpu


def _sru_kernel(x_ref, a_ref, c_ref, o_ref, *, eps, gate, inv_n, gh):
    # x_ref : (TN, G, L)   TN samples, G groups, L = cpg*HW flattened on lanes
    # a_ref : (G, L)       weight * w_gamma, broadcast per channel over HW
    # c_ref : (G, L)       bias   * w_gamma, broadcast per channel over HW
    x = x_ref[...]                                            # (TN, G, L)
    a = a_ref[...]                                            # (G, L)
    c = c_ref[...]                                            # (G, L)

    # --- GroupNorm stats: single-pass, two independent lane-axis reduces.
    s1 = jnp.sum(x, axis=-1, keepdims=True)                   # (TN, G, 1)
    s2 = jnp.sum(x * x, axis=-1, keepdims=True)               # (TN, G, 1)
    mean = s1 * inv_n
    var = jnp.maximum(s2 * inv_n - mean * mean, 0.0)
    x_norm = (x - mean) * lax.rsqrt(var + eps)

    # --- gating (GroupNorm affine and the w_gamma scale are fused into a / c
    #     in the wrapper, so gn itself never exists).  sigmoid -> EUP.
    rw = jax.nn.sigmoid(x_norm * a[None, :, :] + c[None, :, :])
    t = rw * x
    mask = rw > gate
    x1 = jnp.where(mask, x, t)                                # w1 branch
    x2 = jnp.where(mask, 0.0, t)                              # w2 branch

    # --- reconstruct: swap the two group halves of x2 (sublane-aligned swap)
    #     and add, then a single full-tile lane-dense store.
    x2_sw = jnp.concatenate([x2[:, gh:, :], x2[:, :gh, :]], axis=1)
    o_ref[...] = x1 + x2_sw


def _pick_tn(n, bytes_per_sample, target_bytes=2 << 20):
    """Largest divisor of n with block <= target bytes and >= 2 grid blocks."""
    best = 1
    for tn in range(1, n + 1):
        if n % tn:
            continue
        if tn * bytes_per_sample > target_bytes:
            break
        if n >= 2 and n // tn < 2:
            break
        best = tn
    return best


def sru_forward(x, weight, bias, *, group_num=16, gate_threshold=0.5, eps=1e-5):
    """x: (N, C, H, W) float32. Returns (N, C, H, W) float32."""
    N, C, H, W = x.shape
    G = group_num
    assert C % G == 0, "channels must be divisible by group_num"
    assert G % 2 == 0, "group_num must be even so C//2 aligns with group boundaries"
    cpg = C // G
    HW = H * W
    L = cpg * HW                                  # lane axis of each group row

    # Lane-dense layout: (N, G, L); params pre-broadcast & fused to (G, L).
    x_g = x.reshape(N, G, L).astype(jnp.float32)
    w32 = weight.astype(jnp.float32)
    b32 = bias.astype(jnp.float32)
    w_gamma = w32 / jnp.sum(w32)                  # per-channel, sum over C
    a_g = jnp.repeat((w32 * w_gamma).reshape(G, cpg), HW, axis=1)   # (G, L)
    c_g = jnp.repeat((b32 * w_gamma).reshape(G, cpg), HW, axis=1)   # (G, L)

    TN = _pick_tn(N, C * HW * 4)
    grid = (N // TN,)

    kernel = functools.partial(
        _sru_kernel, eps=eps, gate=gate_threshold, inv_n=1.0 / float(L), gh=G // 2
    )

    out = pl.pallas_call(
        kernel,
        out_shape=jax.ShapeDtypeStruct((N, G, L), jnp.float32),
        grid=grid,
        in_specs=[
            pl.BlockSpec((TN, G, L), lambda n: (n, 0, 0)),
            pl.BlockSpec((G, L), lambda n: (0, 0)),   # resident across grid
            pl.BlockSpec((G, L), lambda n: (0, 0)),   # resident across grid
        ],
        out_specs=pl.BlockSpec((TN, G, L), lambda n: (n, 0, 0)),
        compiler_params=pltpu.CompilerParams(
            dimension_semantics=("parallel",),
        ),
    )(x_g, a_g, c_g)

    return out.reshape(N, C, H, W)


def sru_reference(x, weight, bias, *, group_num=16, gate_threshold=0.5, eps=1e-5):
    """Pure-JAX reference matching the PyTorch SRU (torch_gn=True) forward."""
    N, C, H, W = x.shape
    xg = x.reshape(N, group_num, -1)
    mean = xg.mean(axis=2, keepdims=True)
    var = jnp.mean(jnp.square(xg - mean), axis=2, keepdims=True)
    xn = (xg - mean) / jnp.sqrt(var + eps)
    gn = xn.reshape(N, C, H, W) * weight[None, :, None, None] + bias[None, :, None, None]
    wg = weight / jnp.sum(weight)
    rw = jax.nn.sigmoid(gn * wg[None, :, None, None])
    w1 = jnp.where(rw > gate_threshold, jnp.ones_like(rw), rw)
    w2 = jnp.where(rw > gate_threshold, jnp.zeros_like(rw), rw)
    x1 = w1 * x
    x2 = w2 * x
    h = C // 2
    return jnp.concatenate([x1[:, :h] + x2[:, h:], x1[:, h:] + x2[:, :h]], axis=1)


if __name__ == "__main__":
    key = jax.random.PRNGKey(0)
    kx, kw, kb = jax.random.split(key, 3)

    N, C, H, W = 2, 32, 16, 16      # C must be >= group_num (16); H*W = 256
    group_num = 16

    x = jax.random.normal(kx, (N, C, H, W), dtype=jnp.float32)
    # Deterministic synthetic GroupNorm parameters (learnable in the module).
    weight = 1.0 + 0.1 * jax.random.normal(kw, (C,), dtype=jnp.float32)
    bias = 0.1 * jax.random.normal(kb, (C,), dtype=jnp.float32)

    y = sru_forward(x, weight, bias, group_num=group_num)
    y = jax.block_until_ready(y)

    y_ref = sru_reference(x, weight, bias, group_num=group_num)
    assert y.shape == (N, C, H, W)
    assert jnp.max(jnp.abs(y - y_ref)) < 1e-4, "mismatch vs reference"

    print("KERNEL_OK")
</pallas_src>

<mosaic_0001>
module attributes {stable_mosaic.version = 11 : i64} {
  func.func @_sru_kernel(%arg0: i32, %arg1: memref<1x16x512xf32, #tpu.memory_space<vmem>>, %arg2: memref<16x512xf32, #tpu.memory_space<vmem>>, %arg3: memref<16x512xf32, #tpu.memory_space<vmem>>, %arg4: memref<1x16x512xf32, #tpu.memory_space<vmem>>) attributes {dimension_semantics = [#tpu.dimension_semantics<parallel>], iteration_bounds = array<i64: 2>, scalar_prefetch = 0 : i64, scratch_operands = 0 : i64, tpu.core_type = #tpu.core_type<tc>, window_params = [{transform_indices = @transform_0, window_bounds = array<i64: 1, 16, 512>}, {pipeline_mode = #tpu.pipeline_mode<synchronous>, transform_indices = @transform_1, window_bounds = array<i64: 16, 512>}, {pipeline_mode = #tpu.pipeline_mode<synchronous>, transform_indices = @transform_2, window_bounds = array<i64: 16, 512>}, {transform_indices = @transform_3, window_bounds = array<i64: 1, 16, 512>}]} {
    %c0 = arith.constant 0 : index
    %c0_0 = arith.constant 0 : index
    %c0_1 = arith.constant 0 : index
    %0 = vector.load %arg1[%c0, %c0_0, %c0_1] : memref<1x16x512xf32, #tpu.memory_space<vmem>>, vector<1x16x512xf32>
    %c0_2 = arith.constant 0 : index
    %c0_3 = arith.constant 0 : index
    %1 = vector.load %arg2[%c0_2, %c0_3] : memref<16x512xf32, #tpu.memory_space<vmem>>, vector<16x512xf32>
    %c0_4 = arith.constant 0 : index
    %c0_5 = arith.constant 0 : index
    %2 = vector.load %arg3[%c0_4, %c0_5] : memref<16x512xf32, #tpu.memory_space<vmem>>, vector<16x512xf32>
    %cst = arith.constant dense<0.000000e+00> : vector<1x16xf32>
    %3 = vector.multi_reduction <add>, %0, %cst [2] : vector<1x16x512xf32> to vector<1x16xf32>
    %4 = vector.shape_cast %3 : vector<1x16xf32> to vector<1x16x1xf32>
    %5 = arith.mulf %0, %0 : vector<1x16x512xf32>
    %cst_6 = arith.constant dense<0.000000e+00> : vector<1x16xf32>
    %6 = vector.multi_reduction <add>, %5, %cst_6 [2] : vector<1x16x512xf32> to vector<1x16xf32>
    %7 = vector.shape_cast %6 : vector<1x16xf32> to vector<1x16x1xf32>
    %cst_7 = arith.constant 0.001953125 : f32
    %8 = vector.broadcast %cst_7 : f32 to vector<1x16x1xf32>
    %9 = arith.mulf %4, %8 : vector<1x16x1xf32>
    %cst_8 = arith.constant 0.001953125 : f32
    %10 = vector.broadcast %cst_8 : f32 to vector<1x16x1xf32>
    %11 = arith.mulf %7, %10 : vector<1x16x1xf32>
    %12 = arith.mulf %9, %9 : vector<1x16x1xf32>
    %13 = arith.subf %11, %12 : vector<1x16x1xf32>
    %cst_9 = arith.constant 0.000000e+00 : f32
    %14 = vector.broadcast %cst_9 : f32 to vector<1x16x1xf32>
    %15 = arith.maximumf %13, %14 : vector<1x16x1xf32>
    %16 = vector.broadcast %9 : vector<1x16x1xf32> to vector<1x16x512xf32>
    %17 = arith.subf %0, %16 : vector<1x16x512xf32>
    %cst_10 = arith.constant 9.99999974E-6 : f32
    %18 = vector.broadcast %cst_10 : f32 to vector<1x16x1xf32>
    %19 = arith.addf %15, %18 : vector<1x16x1xf32>
    %20 = math.rsqrt %19 : vector<1x16x1xf32>
    %21 = vector.broadcast %20 : vector<1x16x1xf32> to vector<1x16x512xf32>
    %22 = arith.mulf %17, %21 : vector<1x16x512xf32>
    %23 = vector.shape_cast %1 : vector<16x512xf32> to vector<1x16x512xf32>
    %24 = arith.mulf %22, %23 : vector<1x16x512xf32>
    %25 = vector.shape_cast %2 : vector<16x512xf32> to vector<1x16x512xf32>
    %26 = arith.addf %24, %25 : vector<1x16x512xf32>
    %27 = arith.negf %26 : vector<1x16x512xf32>
    %28 = math.exp %27 : vector<1x16x512xf32>
    %cst_11 = arith.constant 1.000000e+00 : f32
    %29 = vector.broadcast %cst_11 : f32 to vector<1x16x512xf32>
    %30 = arith.addf %29, %28 : vector<1x16x512xf32>
    %31 = arith.divf %29, %30 : vector<1x16x512xf32>
    %32 = arith.mulf %31, %0 : vector<1x16x512xf32>
    %cst_12 = arith.constant 5.000000e-01 : f32
    %33 = vector.broadcast %cst_12 : f32 to vector<1x16x512xf32>
    %34 = arith.cmpf ogt, %31, %33 : vector<1x16x512xf32>
    %35 = arith.select %34, %0, %32 : vector<1x16x512xi1>, vector<1x16x512xf32>
    %cst_13 = arith.constant 0.000000e+00 : f32
    %36 = vector.broadcast %cst_13 : f32 to vector<1x16x512xf32>
    %37 = arith.select %34, %36, %32 : vector<1x16x512xi1>, vector<1x16x512xf32>
    %38 = vector.extract_strided_slice %37 {offsets = [0, 8, 0], sizes = [1, 8, 512], strides = [1, 1, 1]} : vector<1x16x512xf32> to vector<1x8x512xf32>
    %39 = vector.extract_strided_slice %37 {offsets = [0, 0, 0], sizes = [1, 8, 512], strides = [1, 1, 1]} : vector<1x16x512xf32> to vector<1x8x512xf32>
    %40 = tpu.concatenate %38, %39 in 1 : vector<1x8x512xf32>, vector<1x8x512xf32> -> vector<1x16x512xf32>
    %41 = arith.addf %35, %40 : vector<1x16x512xf32>
    %c0_14 = arith.constant 0 : index
    %c0_15 = arith.constant 0 : index
    %c0_16 = arith.constant 0 : index
    %42 = vector.load %arg4[%c0_14, %c0_15, %c0_16] : memref<1x16x512xf32, #tpu.memory_space<vmem>>, vector<1x16x512xf32>
    tpu.vector_store %arg4[%c0_14, %c0_15, %c0_16], %41 {strides = array<i32>} : memref<1x16x512xf32, #tpu.memory_space<vmem>>, vector<1x16x512xf32>,
    return
  }
  func.func @transform_0(%arg0: i32) -> (i32, i32, i32) {
    %c0_i32 = arith.constant 0 : i32
    %c0_i32_0 = arith.constant 0 : i32
    %c0_i32_1 = arith.constant 0 : i32
    return %arg0, %c0_i32, %c0_i32_0 : i32, i32, i32
  }
  func.func @transform_1(%arg0: i32) -> (i32, i32) {
    %c0_i32 = arith.constant 0 : i32
    %c0_i32_0 = arith.constant 0 : i32
    %c0_i32_1 = arith.constant 0 : i32
    return %c0_i32, %c0_i32_0 : i32, i32
  }
  func.func @transform_2(%arg0: i32) -> (i32, i32) {
    %c0_i32 = arith.constant 0 : i32
    %c0_i32_0 = arith.constant 0 : i32
    %c0_i32_1 = arith.constant 0 : i32
    return %c0_i32, %c0_i32_0 : i32, i32
  }
  func.func @transform_3(%arg0: i32) -> (i32, i32, i32) {
    %c0_i32 = arith.constant 0 : i32
    %c0_i32_0 = arith.constant 0 : i32
    %c0_i32_1 = arith.constant 0 : i32
    return %arg0, %c0_i32, %c0_i32_0 : i32, i32, i32
  }
}

</mosaic_0001>

<bundles_post_ra>
// kernel: tpu_custom_call.1
= control target key start
LH: loop header
LB: loop body
LE: loop exit
PB: predicated region body
PF: predicated region fallthrough
CT: control target
= control target key end

     0   :  { %8 = vsyncpa [#allocation3], 0  ;;  %s1096_s0 = inlined_call_operand.hbm [shape: f32[2,16,512], index: 0, kind: input, shape index: {}]   ;;  %s1097_s1 = inlined_call_operand.hbm [shape: f32[16,512], index: 1, kind: input, shape index: {}]   ;;  %s1098_s2 = inlined_call_operand.hbm [shape: f32[16,512], index: 2, kind: input, shape index: {}]   ;;  %s1099_s3 = inlined_call_operand.hbm [shape: f32[2,16,512], index: 3, kind: output, shape index: {}]  }
   0x1   :  { %10 = vsyncpa [#allocation3 + $0x1], 0 }
   0x2   :  { %11 = vsyncpa [#allocation6], 0 }
   0x3   :  { %12 = vsyncpa [#allocation4], 0 }
   0x4   :  { %14 = vsyncpa [#allocation4 + $0x1], 0  ;;  %s831_s12 = smov 0   ;;  %s833_s13 = smov 0  }
   0x5   :  { %s835_s14 = smov 0   ;;  %s837_s15 = smov 0  }
   0x6 LB: > { %s852_s16 = sadd.s32 4294967295, %s801_s15   ;;  %s518_s17 = sadd.s32 4294967294, %s801_s15   ;;  %s801_s15 = sphi %s837_s15, %s1120_s15   ;;  %s797_s14 = sphi %s835_s14, %s1119_s14   ;;  %s793_s13 = sphi %s833_s13, %s1118_s13   ;;  %s789_s12 = sphi %s831_s12, %s1117_s12  }
   0x7   : > { %p40_p0 = scmp.ne.s32.totalorder %s793_s13, %s789_s12  ;;  %p1100_p1 = scmp.eq.s32.totalorder %s852_s16, 0 }
   0x8   : > { %p106_p2 = scmp.eq.s32.totalorder %s852_s16, 1  ;;  %p112_p3 = scmp.eq.s32.totalorder %s518_s17, 1 }
   0x9   : > { %p861_p4 = por %p1100_p1, %p40_p0  ;;  %p519_p5 = scmp.ge.s32.totalorder %s801_s15, 1 }
   0xa   : > { %p866_p6 = por %p112_p3, %p40_p0  ;;  %p119_p7 = scmp.lt.s32.totalorder %s801_s15, 3 }
   0xb   : > { %s1104_s18 = scalar_select %p861_p4, 1, 0 }
   0xc   : > { %s1105_s19 = scalar_select %p866_p6, 1, 0 }
   0xd   : > { %p871_p8 = pnand %p519_p5, %p119_p7  ;;  %s803_s21 = smov [#allocation5]  }
   0xe   : > { %s131_s22 = sshll.u32 %s803_s21, 4  ;;  %s804_s24 = smov [#allocation7]   ;;  %s132_s22 = int_to_ptr.vmem [resolvable:$true] %s131_s22 }
   0xf   : > { %s1106_s20 = scalar_select %p871_p8, 1, 0 }
  0x10   : > { %p558_p9 = pneg %p871_p8  ;;  %s144_s25 = sshll.u32 %s804_s24, 4  ;;  %s145_s25 = int_to_ptr.vmem [resolvable:$true] %s144_s25 }
  0x11   : > { %s664_s26 = scalar_lea.vmem %s132_s22, 1024  ;;  %p672_p5 = scmp.lt.s32.totalorder %s132_s22, %s132_s22 }
  0x12   : > { %p880_p11 = pnand %p558_p9, %p1100_p1  ;;  %p665_p13 = scmp.ne.s32.totalorder %s132_s22, %s664_s26 }
  0x13   : > { %p673_p7 = scmp.lt.s32.totalorder %s664_s26, %s664_s26 }
  0x14   : > { %p655_p12 = pneg %p880_p11 }
  0x15   : > { %p674_p10 = por %p673_p7, %p672_p5 }
  0x16   : > { %p667_p0 = pnand %p665_p13, %p655_p12 }
  0x18   : > { %p668_p3 = pneg %p667_p0 }
  0x1a   : > { %p675_p9 = pnand %p674_p10, %p668_p3 }
  0x1c   : > { %678 = shalt.err (!%p675_p9)
}
  0x1d   : > { %s805_s27 = smov 512   ;;  %s806_s28 = smov 32  }
  0x1e   : > { %561 = dma.hbm_to_vmem [thread:$0]  (!%p880_p11), %s1097_s1, 1024, %s132_s22, [#allocation6], %s805_s27, %s805_s27, %s806_s28  }
  0x1f   : > { %s690_s4 = scalar_lea.vmem %s145_s25, 1024  ;;  %p698_p10 = scmp.lt.s32.totalorder %s145_s25, %s145_s25 }
  0x20   : > { %p691_p13 = scmp.ne.s32.totalorder %s145_s25, %s690_s4  ;;  %p699_p3 = scmp.lt.s32.totalorder %s690_s4, %s690_s4 }
  0x22   : > { %p693_p0 = pnand %p691_p13, %p655_p12  ;;  %p700_p7 = por %p699_p3, %p698_p10 }
  0x24   : > { %p694_p5 = pneg %p693_p0 }
  0x26   : > { %p701_p9 = pnand %p700_p7, %p694_p5 }
  0x28   : > { %704 = shalt.err (!%p701_p9)
}
  0x29   : > { %564 = dma.hbm_to_vmem [thread:$0]  (!%p880_p11), %s1098_s2, 1024, %s145_s25, [#allocation6], %s805_s27, %s805_s27, %s806_s28  }
  0x2a   : > { %s909_s7 = sadd.s32 1, %s801_s15   ;;  %s27_s8 = sadd.s32 1, %s797_s14 }
  0x2b   : > { %s24_s9 = ssub.s32 %s801_s15, %s909_s7  ;;  %p34_p12 = scmp.ne.s32.totalorder %s797_s14, %s793_s13 }
  0x2c   : > { %p25_p13 = scmp.eq.s32.totalorder %s24_s9, 0  ;;  %p35_p0 = scmp.eq.s32.totalorder %s801_s15, 0 }
  0x2d   : > { %p919_p5 = por %p106_p2, %p34_p12  ;;  %p575_p10 = scmp.lt.s32.totalorder %s801_s15, 2 }
  0x2e   : > { %s925_s11 = scalar_select %p25_p13, %s797_s14, %s27_s8  }
  0x2f   : > { %s1108_s10 = scalar_select %p919_p5, 1, 0 }
  0x30   : > { %p36_p3 = por %p35_p0, %p34_p12  ;;  %s158_s17 = sand.u32 1, %s797_s14  }
  0x31   : > { %s523_s21 = sshll.u32 %s158_s17, 6  ;;  %s544_s22 = sshll.u32 %s801_s15, 10 }
  0x32   : > { %s932_s25 = scalar_lea.hbm %s1096_s0, %s544_s22  ;;  %s162_s26 = scalar_lea.vmem [#allocation2], %s523_s21 }
  0x33   : > { %s169_s29 = sshll.u32 %s162_s26, 4  ;;  %p936_p2 = pnand %p575_p10, %p36_p3  ;;  %s934_s29 = int_to_ptr.vmem [resolvable:$true] %s169_s29 }
  0x34   : > { %s940_s4 = scalar_lea.sflag [#allocation3], %s158_s17  ;;  %s705_s5 = scalar_lea.hbm %s932_s25, 1024 }
  0x35   : > { %p706_p11 = scmp.ne.s32.totalorder %s932_s25, %s705_s5  ;;  %p707_p7 = pneg %p936_p2 }
  0x36   : > { %s710_s9 = scalar_lea.hbm %s1096_s0, 2048  ;;  %p711_p13 = scmp.lt.s32.totalorder %s932_s25, %s1096_s0 }
  0x37   : > { %p708_p9 = pnand %p707_p7, %p706_p11  ;;  %p712_p0 = scmp.lt.s32.totalorder %s710_s9, %s705_s5 }
  0x39   : > { %p709_p12 = pneg %p708_p9  ;;  %p713_p10 = por %p712_p0, %p711_p13 }
  0x3b   : > { %p714_p3 = pnand %p713_p10, %p709_p12 }
  0x3d   : > { %717 = shalt.err (!%p714_p3)
}
  0x3e   : > { %s718_s17 = scalar_lea.vmem %s934_s29, 1024  ;;  %s807_s23 = smov [#allocation2]  }
  0x3f   : > { %p719_p1 = scmp.ne.s32.totalorder %s934_s29, %s718_s17  ;;  %s723_s24 = sshll.u32 %s807_s23, 4  ;;  %s724_s24 = int_to_ptr.vmem [resolvable:$false] %s723_s24 }
  0x40   : > { %s725_s26 = scalar_lea.vmem %s724_s24, 2048  ;;  %p726_p9 = scmp.lt.s32.totalorder %s934_s29, %s724_s24 }
  0x41   : > { %p721_p6 = pnand %p719_p1, %p707_p7  ;;  %p727_p5 = scmp.lt.s32.totalorder %s725_s26, %s718_s17 }
  0x43   : > { %p722_p11 = pneg %p721_p6  ;;  %p728_p4 = por %p727_p5, %p726_p9 }
  0x45   : > { %p729_p8 = pnand %p728_p4, %p722_p11 }
  0x47   : > { %732 = shalt.err (!%p729_p8)
}
  0x48   : > { %568 = dma.hbm_to_vmem [thread:$0]  (!%p936_p2), %s932_s25, 1024, %s934_s29, %s940_s4, %s805_s27, %s805_s27, %s806_s28  }
  0x49   : > { %p1110_p1 = scmp.ne.s32.totalorder %s1106_s20, 0 }
  0x4a   : > { %s967_s5 = sand.u32 (!%p1110_p1), 1, %s793_s13   ;;  %p1111_p4 = scmp.ne.s32.totalorder (!%p1110_p1), %s1104_s18, 0 }
  0x4b   : > { %181 = sbr.rel (%p1110_p1) target bundleno = 320 (0x140), region = 32  ;;  %s527_s6 = sshll.u32 (!%p1110_p1), %s967_s5, 6 }
  0x4c   : > { %s184_s8 = scalar_lea.sflag (!%p1110_p1), [#allocation3], %s967_s5  ;;  %s187_s30 = scalar_lea.vmem (!%p1110_p1), [#allocation2], %s527_s6 }
  0x50   : > { %776 = dma.done.wait (%p1111_p4), %s184_s8, 1024  }
  0x51   : > { %778 = vsyncadd (%p1111_p4), %s184_s8, 4294966272  ;;  %p1112_p6 = scmp.eq.s32.totalorder %s852_s16, 0 }
  0x53   : > { %780 = dma.done.wait (%p1112_p6), [#allocation6], 2048   ;;  %p1113_p8 = pmov %p1112_p6 }
  0x54   : > { %v981_v0 = vld [vmem:[%s187_s30] sm:$0xff]  ;;  %v983_v1 = vld [vmem:[%s187_s30 + $0x8] sm:$0xff]  ;;  %v985_v2 = vld [vmem:[%s187_s30 + $0x10] sm:$0xff]  ;;  %s545_s18 = sshll.u32 %s852_s16, 10  ;;  %s217_s20 = scalar_lea.vmem [#allocation8], %s527_s6 }
  0x55   : > { %782 = vsyncadd (%p1113_p8), [#allocation6], 4294965248  ;;  %v987_v3 = vld [vmem:[%s187_s30 + $0x18] sm:$0xff]  ;;  %v242_v4 = vadd.f32 %v983_v1, %v981_v0  ;;  %v252_v5 = vmul.f32 %v981_v0, %v981_v0  ;;  %v253_v6 = vmul.f32 %v983_v1, %v983_v1  ;;  %v254_v7 = vmul.f32 %v985_v2, %v985_v2  ;;  %v997_v8 = vld [vmem:[%s187_s30 + $0x20] sm:$0xff]  ;;  %s426_s27 = sshll.u32 %s217_s20, 4  ;;  %s1051_s25 = scalar_lea.hbm %s1099_s3, %s545_s18  ;;  %s1053_s27 = int_to_ptr.vmem [resolvable:$true] %s426_s27 }
  0x56   : > { %v999_v9 = vld [vmem:[%s187_s30 + $0x28] sm:$0xff]  ;;  %v1001_v10 = vld [vmem:[%s187_s30 + $0x30] sm:$0xff]  ;;  %v1003_v11 = vld [vmem:[%s187_s30 + $0x38] sm:$0xff]  ;;  %v256_v13 = vmul.f32 %v997_v8, %v997_v8  ;;  %v255_v16 = vmul.f32 %v987_v3, %v987_v3  ;;  %s413_s29 = scalar_lea.sflag [#allocation4], %s967_s5  ;;  %s733_s4 = scalar_lea.vmem %s1053_s27, 1024 }
  0x57   : > { %v247_v12 = vadd.f32 %v999_v9, %v997_v8  ;;  %v257_v14 = vmul.f32 %v999_v9, %v999_v9  ;;  %v243_v15 = vadd.f32 %v242_v4, %v985_v2  ;;  %v260_v17 = vadd.f32 %v253_v6, %v252_v5  ;;  %v226_v48 = vld [vmem:[#allocation5] sm:$0xff]  ;;  %v227_v50 = vld [vmem:[#allocation5 + $0x8] sm:$0xff]  ;;  %v228_v51 = vld [vmem:[#allocation5 + $0x10] sm:$0xff]  ;;  %p734_p5 = scmp.ne.s32.totalorder %s1053_s27, %s733_s4  ;;  %p1114_p2 = scmp.ne.s32.totalorder %s1108_s10, 0 }
  0x58   : > { %v258_v18 = vmul.f32 %v1001_v10, %v1001_v10  ;;  %v259_v23 = vmul.f32 %v1003_v11, %v1003_v11  ;;  %v229_v52 = vld [vmem:[#allocation5 + $0x18] sm:$0xff]  ;;  %v234_v53 = vld [vmem:[#allocation7] sm:$0xff]  ;;  %v235_v58 = vld [vmem:[#allocation7 + $0x8] sm:$0xff]  ;;  %s808_s9 = smov [#allocation8]  }
  0x59   : > { %v248_v19 = vadd.f32 %v247_v12, %v1001_v10  ;;  %v265_v20 = vadd.f32 %v257_v14, %v256_v13  ;;  %v244_v21 = vadd.f32 %v243_v15, %v987_v3  ;;  %v261_v22 = vadd.f32 %v260_v17, %v254_v7  ;;  %v236_v59 = vld [vmem:[#allocation7 + $0x10] sm:$0xff]  ;;  %v237_v60 = vld [vmem:[#allocation7 + $0x18] sm:$0xff]  ;;  %v230_v14 = vld [vmem:[#allocation5 + $0x20] sm:$0xff]  ;;  %p735_p7 = pnand %p734_p5, %p1114_p2  ;;  %s737_s21 = sshll.u32 %s808_s9, 4  ;;  %s738_s21 = int_to_ptr.vmem [resolvable:$false] %s737_s21 }
  0x5a   : > { %s739_s22 = scalar_lea.vmem %s738_s21, 2048  ;;  %p740_p13 = scmp.lt.s32.totalorder %s1053_s27, %s738_s21 }
  0x5b   : > { %v266_v24 = vadd.f32 %v265_v20, %v258_v18  ;;  %245 = vadd.xlane.f32.xlu0 %v244_v21  ;;  %v262_v25 = vadd.f32 %v261_v22, %v255_v16  ;;  %v249_v26 = vadd.f32 %v248_v19, %v1003_v11  ;;  %v231_v19 = vld [vmem:[#allocation5 + $0x28] sm:$0xff]  ;;  %v232_v20 = vld [vmem:[#allocation5 + $0x30] sm:$0xff]  ;;  %v233_v21 = vld [vmem:[#allocation5 + $0x38] sm:$0xff]  ;;  %p736_p12 = pneg %p735_p7  ;;  %p741_p0 = scmp.lt.s32.totalorder %s739_s22, %s733_s4 }
  0x5c   : > { %v238_v22 = vld [vmem:[#allocation7 + $0x20] sm:$0xff] }
  0x5d   : > { %263 = vadd.xlane.f32.xlu1 %v262_v25  ;;  %v267_v27 = vadd.f32 %v266_v24, %v259_v23  ;;  %v239_v23 = vld [vmem:[#allocation7 + $0x28] sm:$0xff]  ;;  %v240_v24 = vld [vmem:[#allocation7 + $0x30] sm:$0xff]  ;;  %p742_p10 = por %p741_p0, %p740_p13 }
  0x5f   : > { %250 = vadd.xlane.f32.xlu0 %v249_v26  ;;  %p743_p3 = pnand %p742_p10, %p736_p12 }
  0x61   : > { %268 = vadd.xlane.f32.xlu1 %v267_v27 }
  0xe4   : > { %v246_v28 = vpop.xlane.xlu0 %245 }
  0xe5   : > { %v270_v29 = vmul.f32 0.001953125, %v246_v28 }
  0xe6   : > { %v264_v30 = vpop.xlane.xlu1 %263 }
  0xe7   : > { %v272_v31 = vmul.f32 0.001953125, %v264_v30  ;;  %v274_v32 = vmul.f32 %v270_v29, %v270_v29  ;;  %v280_v44 = vsub.f32 %v981_v0, %v270_v29  ;;  %v281_v45 = vsub.f32 %v983_v1, %v270_v29 }
  0xe8   : > { %v251_v33 = vpop.xlane.xlu0 %250  ;;  %v282_v46 = vsub.f32 %v985_v2, %v270_v29  ;;  %v283_v47 = vsub.f32 %v987_v3, %v270_v29 }
  0xe9   : > { %v271_v34 = vmul.f32 0.001953125, %v251_v33  ;;  %v276_v35 = vsub.f32 %v272_v31, %v274_v32  ;;  %v241_v33 = vld [vmem:[#allocation7 + $0x38] sm:$0xff] }
  0xea   : > { %v269_v36 = vpop.xlane.xlu1 %268 }
  0xeb   : > { %v278_v37 = vmax.f32 %v276_v35, 0.0  ;;  %v273_v38 = vmul.f32 0.001953125, %v269_v36  ;;  %v275_v39 = vmul.f32 %v271_v34, %v271_v34  ;;  %v284_v6 = vsub.f32 %v997_v8, %v271_v34 }
  0xec   : > { %v285_v7 = vsub.f32 %v999_v9, %v271_v34  ;;  %v286_v12 = vsub.f32 %v1001_v10, %v271_v34  ;;  %v287_v13 = vsub.f32 %v1003_v11, %v271_v34 }
  0xed   : > { %v288_v40 = vadd.f32 1e-05, %v278_v37  ;;  %v277_v41 = vsub.f32 %v273_v38, %v275_v39 }
  0xef   : > { %617 = vrsqrt.f32 %v288_v40  ;;  %v279_v42 = vmax.f32 %v277_v41, 0.0 }
  0xf1   : > { %v289_v43 = vadd.f32 1e-05, %v279_v42 }
  0xf3   : > { %619 = vrsqrt.f32 %v289_v43 }
  0xfc   : > { %v618_v49 = vpop.eup %617 }
  0xfd   : > { %v292_v54 = vmul.f32 %v618_v49, %v280_v44  ;;  %v293_v55 = vmul.f32 %v618_v49, %v281_v45  ;;  %v294_v56 = vmul.f32 %v618_v49, %v282_v46  ;;  %v295_v57 = vmul.f32 %v618_v49, %v283_v47 }
  0xff   : > { %v300_v61 = vmul.f32 %v292_v54, %v226_v48  ;;  %v301_v62 = vmul.f32 %v293_v55, %v227_v50  ;;  %v302_v63 = vmul.f32 %v294_v56, %v228_v51  ;;  %v303_v4 = vmul.f32 %v295_v57, %v229_v52 }
 0x100   : > { %v620_v5 = vpop.eup %619 }
 0x101   : > { %v308_v15 = vadd.f32 %v300_v61, %v234_v53  ;;  %v309_v16 = vadd.f32 %v301_v62, %v235_v58  ;;  %v310_v17 = vadd.f32 %v302_v63, %v236_v59  ;;  %v311_v18 = vadd.f32 %v303_v4, %v237_v60 }
 0x102   : > { %v296_v25 = vmul.f32 %v620_v5, %v284_v6  ;;  %v297_v26 = vmul.f32 %v620_v5, %v285_v7  ;;  %v298_v27 = vmul.f32 %v620_v5, %v286_v12  ;;  %v299_v28 = vmul.f32 %v620_v5, %v287_v13 }
 0x103   : > { %v531_v29 = vmul.f32 -1.442695, %v308_v15  ;;  %v532_v30 = vmul.f32 -1.442695, %v309_v16  ;;  %v533_v31 = vmul.f32 -1.442695, %v310_v17 }
 0x104   : > { %v534_v32 = vmul.f32 -1.442695, %v311_v18  ;;  %v304_v34 = vmul.f32 %v296_v25, %v230_v14  ;;  %v305_v35 = vmul.f32 %v297_v26, %v231_v19  ;;  %v306_v36 = vmul.f32 %v298_v27, %v232_v20 }
 0x105   : > { %621 = vpow2.f32 %v531_v29  ;;  %v307_v37 = vmul.f32 %v299_v28, %v233_v21 }
 0x106   : > { %623 = vpow2.f32 %v532_v30  ;;  %v312_v38 = vadd.f32 %v304_v34, %v238_v22  ;;  %v313_v39 = vadd.f32 %v305_v35, %v239_v23  ;;  %v314_v40 = vadd.f32 %v306_v36, %v240_v24 }
 0x107   : > { %625 = vpow2.f32 %v533_v31  ;;  %v315_v41 = vadd.f32 %v307_v37, %v241_v33 }
 0x108   : > { %627 = vpow2.f32 %v534_v32  ;;  %v535_v42 = vmul.f32 -1.442695, %v312_v38  ;;  %v536_v43 = vmul.f32 -1.442695, %v313_v39  ;;  %v537_v44 = vmul.f32 -1.442695, %v314_v40 }
 0x109   : > { %v538_v45 = vmul.f32 -1.442695, %v315_v41 }
 0x10a   : > { %629 = vpow2.f32 %v535_v42 }
 0x10b   : > { %631 = vpow2.f32 %v536_v43 }
 0x10c   : > { %633 = vpow2.f32 %v537_v44 }
 0x10d   : > { %635 = vpow2.f32 %v538_v45 }
 0x112   : > { %v622_v46 = vpop.eup %621 }
 0x113   : > { %v624_v47 = vpop.eup %623  ;;  %v340_v48 = vadd.f32 1.0, %v622_v46 }
 0x114   : > { %v626_v49 = vpop.eup %625  ;;  %v341_v50 = vadd.f32 1.0, %v624_v47 }
 0x115   : > { %v628_v51 = vpop.eup %627  ;;  %v342_v52 = vadd.f32 1.0, %v626_v49  ;;  %637 = vrcp.f32 %v340_v48 }
 0x116   : > { %v343_v53 = vadd.f32 1.0, %v628_v51  ;;  %639 = vrcp.f32 %v341_v50 }
 0x117   : > { %v630_v54 = vpop.eup %629  ;;  %641 = vrcp.f32 %v342_v52 }
 0x118   : > { %v632_v55 = vpop.eup %631  ;;  %v344_v56 = vadd.f32 1.0, %v630_v54  ;;  %643 = vrcp.f32 %v343_v53 }
 0x119   : > { %v634_v57 = vpop.eup %633  ;;  %v345_v58 = vadd.f32 1.0, %v632_v55 }
 0x11a   : > { %v636_v59 = vpop.eup %635  ;;  %v346_v60 = vadd.f32 1.0, %v634_v57  ;;  %645 = vrcp.f32 %v344_v56 }
 0x11b   : > { %v347_v61 = vadd.f32 1.0, %v636_v59  ;;  %647 = vrcp.f32 %v345_v58 }
 0x11c   : > { %649 = vrcp.f32 %v346_v60 }
 0x11d   : > { %651 = vrcp.f32 %v347_v61 }
 0x122   : > { %v638_v62 = vpop.eup %637 }
 0x123   : > { %v640_v63 = vpop.eup %639  ;;  %v364_v4 = vmul.f32 %v638_v62, %v981_v0  ;;  %vm372_vm0 = vcmp.gt.f32.partialorder %v638_v62, 0.5 }
 0x124   : > { %v642_v5 = vpop.eup %641  ;;  %v365_v6 = vmul.f32 %v640_v63, %v983_v1  ;;  %vm373_vm1 = vcmp.gt.f32.partialorder %v640_v63, 0.5 }
 0x125   : > { %v644_v7 = vpop.eup %643  ;;  %v366_v12 = vmul.f32 %v642_v5, %v985_v2  ;;  %vm374_vm2 = vcmp.gt.f32.partialorder %v642_v5, 0.5  ;;  %v380_v15 = vsel %vm372_vm0, %v981_v0, %v364_v4  ;;  %v388_v17 = vsel %vm372_vm0, 0.0, %v364_v4 }
 0x126   : > { %v367_v13 = vmul.f32 %v644_v7, %v987_v3  ;;  %vm375_vm3 = vcmp.gt.f32.partialorder %v644_v7, 0.5  ;;  %v381_v16 = vsel %vm373_vm1, %v983_v1, %v365_v6  ;;  %v389_v18 = vsel %vm373_vm1, 0.0, %v365_v6 }
 0x127   : > { %v646_v14 = vpop.eup %645  ;;  %v382_v21 = vsel %vm374_vm2, %v985_v2, %v366_v12  ;;  %v390_v22 = vsel %vm374_vm2, 0.0, %v366_v12 }
 0x128   : > { %v648_v19 = vpop.eup %647  ;;  %v368_v20 = vmul.f32 %v646_v14, %v997_v8  ;;  %vm376_vm4 = vcmp.gt.f32.partialorder %v646_v14, 0.5  ;;  %v383_v25 = vsel %vm375_vm3, %v987_v3, %v367_v13  ;;  %v391_v0 = vsel %vm375_vm3, 0.0, %v367_v13 }
 0x129   : > { %v650_v23 = vpop.eup %649  ;;  %v369_v24 = vmul.f32 %v648_v19, %v999_v9  ;;  %vm377_vm5 = vcmp.gt.f32.partialorder %v648_v19, 0.5 }
 0x12a   : > { %v652_v26 = vpop.eup %651  ;;  %v370_v1 = vmul.f32 %v650_v23, %v1001_v10  ;;  %vm378_vm6 = vcmp.gt.f32.partialorder %v650_v23, 0.5  ;;  %v384_v27 = vsel %vm376_vm4, %v997_v8, %v368_v20  ;;  %v392_v28 = vsel %vm376_vm4, 0.0, %v368_v20 }
 0x12b   : > { %v371_v2 = vmul.f32 %v652_v26, %v1003_v11  ;;  %vm379_vm7 = vcmp.gt.f32.partialorder %v652_v26, 0.5  ;;  %v385_v29 = vsel %vm377_vm5, %v999_v9, %v369_v24  ;;  %v393_v30 = vsel %vm377_vm5, 0.0, %v369_v24 }
 0x12c   : > { %v386_v3 = vsel %vm378_vm6, %v1001_v10, %v370_v1  ;;  %v394_v31 = vsel %vm378_vm6, 0.0, %v370_v1  ;;  %v396_v32 = vadd.f32 %v392_v28, %v380_v15  ;;  %v397_v33 = vadd.f32 %v393_v30, %v381_v16 }
 0x12d   : > { %v387_v34 = vsel %vm379_vm7, %v1003_v11, %v371_v2  ;;  %v395_v35 = vsel %vm379_vm7, 0.0, %v371_v2  ;;  %v398_v8 = vadd.f32 %v394_v31, %v382_v21  ;;  %v400_v36 = vadd.f32 %v388_v17, %v384_v27 }
 0x12e   : > { %v399_v9 = vadd.f32 %v395_v35, %v383_v25  ;;  %v401_v10 = vadd.f32 %v389_v18, %v385_v29  ;;  %v402_v37 = vadd.f32 %v390_v22, %v386_v3  ;;  %v403_v38 = vadd.f32 %v391_v0, %v387_v34  ;;  %404 = vst [vmem:[%s217_s20] sm:$0xff] %v396_v32 }
 0x12f   : > { %405 = vst [vmem:[%s217_s20 + $0x8] sm:$0xff] %v397_v33  ;;  %406 = vst [vmem:[%s217_s20 + $0x10] sm:$0xff] %v398_v8 }
 0x130   : > { %408 = vst [vmem:[%s217_s20 + $0x20] sm:$0xff] %v400_v36  ;;  %407 = vst [vmem:[%s217_s20 + $0x18] sm:$0xff] %v399_v9 }
 0x131   : > { %409 = vst [vmem:[%s217_s20 + $0x28] sm:$0xff] %v401_v10  ;;  %410 = vst [vmem:[%s217_s20 + $0x30] sm:$0xff] %v402_v37 }
 0x132   : > { %411 = vst [vmem:[%s217_s20 + $0x38] sm:$0xff] %v403_v38 }
 0x133   : > { %746 = shalt.err (!%p743_p3)
}
 0x134   : > { %s747_s17 = scalar_lea.hbm %s1051_s25, 1024  ;;  %s751_s26 = scalar_lea.hbm %s1099_s3, 2048 }
 0x135   : > { %p748_p11 = scmp.ne.s32.totalorder %s1051_s25, %s747_s17  ;;  %p752_p4 = scmp.lt.s32.totalorder %s1051_s25, %s1099_s3 }
 0x136   : > { %p753_p6 = scmp.lt.s32.totalorder %s751_s26, %s747_s17 }
 0x137   : > { %p749_p9 = pnand %p748_p11, %p1114_p2 }
 0x138   : > { %p754_p8 = por %p753_p6, %p752_p4 }
 0x139   : > { %p750_p1 = pneg %p749_p9 }
 0x13b   : > { %p755_p5 = pnand %p754_p8, %p750_p1 }
 0x13d   : > { %758 = shalt.err (!%p755_p5)
}
 0x13e   : > { %s809_s30 = smov 512   ;;  %s810_s18 = smov 32  }
 0x13f   : > { %556 = dma.vmem_to_hbm [thread:$0]  (%p1114_p2), %s1053_s27, 1024, %s1051_s25, %s413_s29, %s809_s30, %s809_s30, %s810_s18  }
 0x140 PF: > { %s441_s20 = sand.u32 1, %s789_s12   ;;  %p1115_p7 = scmp.ne.s32.totalorder %s1105_s19, 0 }
 0x141   : > { %p1116_p12 = scmp.ge.s32.totalorder %s801_s15, 2  ;;  %s442_s16 = scalar_lea.sflag [#allocation4], %s441_s20 }
 0x143   : > { %p570_p13 = pnand %p1116_p12, %p1115_p7 }
 0x145   : > { %p571_p0 = pneg %p570_p13 }
 0x147   : > { %784 = dma.done.wait (%p571_p0), %s442_s16, 1024  }
 0x148   : > { %786 = vsyncadd (%p571_p0), %s442_s16, 4294966272  ;;  %p17_p10 = scmp.ge.s32.totalorder %s909_s7, 4   ;;  %s1117_s12 = smov %s793_s13 }
 0x149   : > { %s1118_s13 = smov %s797_s14  ;;  %s1119_s14 = smov %s925_s11 }
 0x14a   : > { %s1120_s15 = smov %s909_s7  ;;  %19 = sbr.rel (!%p17_p10) target bundleno = 6 (0x6), region = 85 }
 0x14f   :  { %447 = vsyncpa [#allocation3], 1 }
 0x150   :  { %449 = vsyncpa [#allocation3 + $0x1], 1 }
 0x151   :  { %450 = vsyncpa [#allocation6], 1 }
 0x152   :  { %451 = vsyncpa [#allocation4], 1 }
 0x153   :  { %453 = vsyncpa [#allocation4 + $0x1], 1 }

</bundles_post_ra>
